<compile_context>
chip_gen: v7x
topology: tpu7x:2x2x1
jax: 0.10.0
libtpu: 0.0.40
codegen_flags: <defaults>
</compile_context>

<pallas_src>
import functools
import math

import jax
import jax.numpy as jnp
from jax.experimental import pallas as pl
from jax.experimental.pallas import tpu as pltpu

_NEG_BIG = -1e30  # pad bias for the softmax lanes beyond output_size


def _round_up(x, m):
    return ((x + m - 1) // m) * m


def _rnn_seq_kernel(x_ref, h0_ref, wx_ref, wh_ref, b_ref,
                    out_ref, hfin_ref, h_state, *, hpad):
    """One grid step = one RNN time step.

    x_ref:   (1, Bp, I)          current-step input block
    h0_ref:  (Bp, HPAD)          initial hidden (resident, constant index_map)
    wx_ref:  (I, HPAD+OPAD)      [W1x | W2x], zero-padded columns
    wh_ref:  (HPAD, HPAD+OPAD)   [W1h | W2h], zero-padded rows/columns
    b_ref:   (1, HPAD+OPAD)      [b1 | b2], padded output lanes = -1e30
    out_ref: (1, Bp, OPAD)       per-step log-softmax block
    hfin_ref:(Bp, HPAD)          final hidden (written on last step only)
    h_state: (Bp, HPAD) VMEM     carried hidden state across grid steps
    """
    t = pl.program_id(0)

    @pl.when(t == 0)
    def _():
        h_state[...] = h0_ref[...]

    x = x_ref[0]                      # (Bp, I)
    h_prev = h_state[...]             # (Bp, HPAD)

    # Single fused matmul for both linear layers (lane-dense 2*128 output).
    acts = (jnp.dot(x, wx_ref[...], preferred_element_type=jnp.float32)
            + jnp.dot(h_prev, wh_ref[...], preferred_element_type=jnp.float32)
            + b_ref[...])             # (Bp, HPAD+OPAD)

    # Hidden path: tanh of the first HPAD lanes (padded lanes stay exactly 0).
    h_new = jnp.tanh(acts[:, :hpad])
    h_state[...] = h_new

    # Output path: log-softmax over the last OPAD lanes.  Padded lanes carry a
    # -1e30 bias, so exp() underflows to 0 and they do not affect the result.
    logits = acts[:, hpad:]
    m = jnp.max(logits, axis=1, keepdims=True)
    z = logits - m
    lse = jnp.log(jnp.sum(jnp.exp(z), axis=1, keepdims=True))
    out_ref[0] = (z - lse).astype(out_ref.dtype)

    @pl.when(t == pl.num_programs(0) - 1)
    def _():
        hfin_ref[...] = h_new.astype(hfin_ref.dtype)


def vanilla_rnn_forward_seq(x_seq, h0, w1, b1, w2, b2):
    """Run T RNN steps inside ONE pallas_call.

    x_seq: (T, B, I)   h0: (B, H)
    w1: (I+H, H), b1: (H,)   -- linear1 (stored input-major: y = x @ W + b)
    w2: (I+H, O), b2: (O,)   -- linear2
    Returns (out_seq (T, B, O) log-probs, h_final (B, H)).
    """
    T, B, I = x_seq.shape
    H = h0.shape[1]
    O = w2.shape[1]
    dtype = jnp.float32

    HPAD = _round_up(H, 128)
    OPAD = _round_up(O, 128)
    BPAD = _round_up(B, 8)

    # --- parameter plumbing (pure JAX glue, done once per launch) -----------
    # Split each weight into its x-rows and h-rows, fuse linear1|linear2
    # column-wise, and pad to lane-dense widths.
    wx = jnp.zeros((I, HPAD + OPAD), dtype)
    wx = wx.at[:, :H].set(w1[:I].astype(dtype))
    wx = wx.at[:, HPAD:HPAD + O].set(w2[:I].astype(dtype))

    wh = jnp.zeros((HPAD, HPAD + OPAD), dtype)
    wh = wh.at[:H, :H].set(w1[I:].astype(dtype))
    wh = wh.at[:H, HPAD:HPAD + O].set(w2[I:].astype(dtype))

    b = jnp.full((1, HPAD + OPAD), _NEG_BIG, dtype)
    b = b.at[0, :H].set(b1.astype(dtype))
    b = b.at[0, H:HPAD].set(0.0)                    # padded hidden lanes -> tanh(0)=0
    b = b.at[0, HPAD:HPAD + O].set(b2.astype(dtype))

    x_p = jnp.zeros((T, BPAD, I), dtype).at[:, :B, :].set(x_seq.astype(dtype))
    h0_p = jnp.zeros((BPAD, HPAD), dtype).at[:B, :H].set(h0.astype(dtype))

    kernel = functools.partial(_rnn_seq_kernel, hpad=HPAD)

    grid_spec = pltpu.PrefetchScalarGridSpec(
        num_scalar_prefetch=0,
        grid=(T,),
        in_specs=[
            pl.BlockSpec((1, BPAD, I), lambda t: (t, 0, 0)),          # x step t
            pl.BlockSpec((BPAD, HPAD), lambda t: (0, 0)),             # h0 (resident)
            pl.BlockSpec((I, HPAD + OPAD), lambda t: (0, 0)),         # Wx (resident)
            pl.BlockSpec((HPAD, HPAD + OPAD), lambda t: (0, 0)),      # Wh (resident)
            pl.BlockSpec((1, HPAD + OPAD), lambda t: (0, 0)),         # bias (resident)
        ],
        out_specs=(
            pl.BlockSpec((1, BPAD, OPAD), lambda t: (t, 0, 0)),       # log-probs step t
            pl.BlockSpec((BPAD, HPAD), lambda t: (0, 0)),             # final hidden
        ),
        scratch_shapes=[pltpu.VMEM((BPAD, HPAD), jnp.float32)],       # carried state
    )

    out_p, hfin_p = pl.pallas_call(
        kernel,
        out_shape=(
            jax.ShapeDtypeStruct((T, BPAD, OPAD), dtype),
            jax.ShapeDtypeStruct((BPAD, HPAD), dtype),
        ),
        grid_spec=grid_spec,
        compiler_params=pltpu.CompilerParams(
            dimension_semantics=("arbitrary",)),  # sequential time recurrence
    )(x_p, h0_p, wx, wh, b)

    return out_p[:, :B, :O], hfin_p[:B, :H]


def vanilla_rnn_forward(x, hidden, w1, b1, w2, b2):
    """Single-step API matching VanillaRNN.forward: returns (output, new_hidden)."""
    out_seq, h_new = vanilla_rnn_forward_seq(x[None], hidden, w1, b1, w2, b2)
    return out_seq[0], h_new


def init_params(key, input_size, hidden_size, output_size):
    """Deterministic init mimicking nn.Linear's U(-1/sqrt(fan_in), 1/sqrt(fan_in)).

    Weights stored (in_features, out_features) so the math is x @ W + b
    (equivalent to PyTorch's x @ W.T + b with W of shape (out, in)).
    """
    fan_in = input_size + hidden_size
    bound = 1.0 / math.sqrt(fan_in)
    k1, k2, k3, k4 = jax.random.split(key, 4)
    w1 = jax.random.uniform(k1, (fan_in, hidden_size), jnp.float32, -bound, bound)
    b1 = jax.random.uniform(k2, (hidden_size,), jnp.float32, -bound, bound)
    w2 = jax.random.uniform(k3, (fan_in, output_size), jnp.float32, -bound, bound)
    b2 = jax.random.uniform(k4, (output_size,), jnp.float32, -bound, bound)
    return w1, b1, w2, b2


if __name__ == "__main__":
    # Small shapes consistent with the module; batch=8 fills the f32 sublanes.
    seq_len = 8
    batch_size = 8
    input_size = 16
    hidden_size = 32
    output_size = 8

    key = jax.random.PRNGKey(0)
    kx, kh, kp = jax.random.split(key, 3)
    x_seq = jax.random.normal(kx, (seq_len, batch_size, input_size), jnp.float32)
    h0 = jax.random.normal(kh, (batch_size, hidden_size), jnp.float32)
    w1, b1, w2, b2 = init_params(kp, input_size, hidden_size, output_size)

    # Full-sequence kernel (time loop inside one pallas_call).
    out_seq, h_fin = vanilla_rnn_forward_seq(x_seq, h0, w1, b1, w2, b2)
    jax.block_until_ready((out_seq, h_fin))

    # Single-step API (module-parity) check as well.
    out_step0, h_step0 = vanilla_rnn_forward(x_seq[0], h0, w1, b1, w2, b2)
    jax.block_until_ready((out_step0, h_step0))

    # ---- plain-JAX reference (same math as the PyTorch module, per step) ----
    h = h0
    outs = []
    for t in range(seq_len):
        concat = jnp.concatenate([x_seq[t], h], axis=1)
        h = jnp.tanh(concat @ w1 + b1)
        logits = concat @ w2 + b2
        outs.append(jax.nn.log_softmax(logits, axis=1))
    out_ref = jnp.stack(outs)
    h_ref = h

    assert out_seq.shape == (seq_len, batch_size, output_size)
    assert h_fin.shape == (batch_size, hidden_size)
    assert jnp.allclose(out_seq, out_ref, atol=2e-4), "sequence output mismatch"
    assert jnp.allclose(h_fin, h_ref, atol=2e-4), "final hidden mismatch"
    assert jnp.allclose(out_step0, out_ref[0], atol=2e-4), "step-0 output mismatch"
    assert jnp.allclose(h_step0, jnp.tanh(
        jnp.concatenate([x_seq[0], h0], axis=1) @ w1 + b1), atol=2e-4), "step-0 hidden mismatch"

    print("KERNEL_OK")
</pallas_src>

<mosaic_0001>
module attributes {stable_mosaic.version = 11 : i64} {
  func.func @_rnn_seq_kernel(%arg0: i32, %arg1: memref<1x8x16xf32, #tpu.memory_space<vmem>>, %arg2: memref<8x128xf32, #tpu.memory_space<vmem>>, %arg3: memref<16x256xf32, #tpu.memory_space<vmem>>, %arg4: memref<128x256xf32, #tpu.memory_space<vmem>>, %arg5: memref<1x256xf32, #tpu.memory_space<vmem>>, %arg6: memref<1x8x128xf32, #tpu.memory_space<vmem>>, %arg7: memref<8x128xf32, #tpu.memory_space<vmem>>, %arg8: memref<8x128xf32, #tpu.memory_space<vmem>>) attributes {dimension_semantics = [#tpu.dimension_semantics<arbitrary>], iteration_bounds = array<i64: 8>, scalar_prefetch = 0 : i64, scratch_operands = 1 : i64, tpu.core_type = #tpu.core_type<tc>, window_params = [{transform_indices = @transform_0, window_bounds = array<i64: 1, 8, 16>}, {pipeline_mode = #tpu.pipeline_mode<synchronous>, transform_indices = @transform_1, window_bounds = array<i64: 8, 128>}, {pipeline_mode = #tpu.pipeline_mode<synchronous>, transform_indices = @transform_2, window_bounds = array<i64: 16, 256>}, {pipeline_mode = #tpu.pipeline_mode<synchronous>, transform_indices = @transform_3, window_bounds = array<i64: 128, 256>}, {pipeline_mode = #tpu.pipeline_mode<synchronous>, transform_indices = @transform_4, window_bounds = array<i64: 1, 256>}, {transform_indices = @transform_5, window_bounds = array<i64: 1, 8, 128>}, {pipeline_mode = #tpu.pipeline_mode<synchronous>, transform_indices = @transform_6, window_bounds = array<i64: 8, 128>}]} {
    %c0_i32 = arith.constant 0 : i32
    %0 = arith.cmpi eq, %arg0, %c0_i32 : i32
    %1 = arith.extui %0 : i1 to i32
    %c0_i32_0 = arith.constant 0 : i32
    %2 = arith.cmpi ne, %1, %c0_i32_0 : i32
    scf.if %2 {
      %c0_20 = arith.constant 0 : index
      %c0_21 = arith.constant 0 : index
      %34 = vector.load %arg2[%c0_20, %c0_21] : memref<8x128xf32, #tpu.memory_space<vmem>>, vector<8x128xf32>
      %c0_22 = arith.constant 0 : index
      %c0_23 = arith.constant 0 : index
      %35 = vector.load %arg8[%c0_22, %c0_23] : memref<8x128xf32, #tpu.memory_space<vmem>>, vector<8x128xf32>
      tpu.vector_store %arg8[%c0_22, %c0_23], %34 {strides = array<i32>} : memref<8x128xf32, #tpu.memory_space<vmem>>, vector<8x128xf32>,
    } else {
    }
    %c0 = arith.constant 0 : index
    %c0_1 = arith.constant 0 : index
    %c0_2 = arith.constant 0 : index
    %3 = vector.load %arg1[%c0, %c0_1, %c0_2] : memref<1x8x16xf32, #tpu.memory_space<vmem>>, vector<1x8x16xf32>
    %4 = vector.shape_cast %3 : vector<1x8x16xf32> to vector<8x16xf32>
    %c0_3 = arith.constant 0 : index
    %c0_4 = arith.constant 0 : index
    %5 = vector.load %arg8[%c0_3, %c0_4] : memref<8x128xf32, #tpu.memory_space<vmem>>, vector<8x128xf32>
    %c0_5 = arith.constant 0 : index
    %c0_6 = arith.constant 0 : index
    %6 = vector.load %arg3[%c0_5, %c0_6] : memref<16x256xf32, #tpu.memory_space<vmem>>, vector<16x256xf32>
    %cst = arith.constant dense<0.000000e+00> : vector<8x256xf32>
    %7 = tpu.matmul %4, %6, %cst {dimension_numbers = #tpu.dot_dimension_numbers<[1], [0], [0], [1], [0, 0, 1, 1], [], []>} : vector<8x16xf32>, vector<16x256xf32>, vector<8x256xf32> -> vector<8x256xf32>
    %c0_7 = arith.constant 0 : index
    %c0_8 = arith.constant 0 : index
    %8 = vector.load %arg4[%c0_7, %c0_8] : memref<128x256xf32, #tpu.memory_space<vmem>>, vector<128x256xf32>
    %cst_9 = arith.constant dense<0.000000e+00> : vector<8x256xf32>
    %9 = tpu.matmul %5, %8, %cst_9 {dimension_numbers = #tpu.dot_dimension_numbers<[1], [0], [0], [1], [0, 0, 1, 1], [], []>} : vector<8x128xf32>, vector<128x256xf32>, vector<8x256xf32> -> vector<8x256xf32>
    %10 = arith.addf %7, %9 : vector<8x256xf32>
    %c0_10 = arith.constant 0 : index
    %c0_11 = arith.constant 0 : index
    %11 = vector.load %arg5[%c0_10, %c0_11] : memref<1x256xf32, #tpu.memory_space<vmem>>, vector<1x256xf32>
    %12 = vector.broadcast %11 : vector<1x256xf32> to vector<8x256xf32>
    %13 = arith.addf %10, %12 : vector<8x256xf32>
    %14 = vector.extract_strided_slice %13 {offsets = [0, 0], sizes = [8, 128], strides = [1, 1]} : vector<8x256xf32> to vector<8x128xf32>
    %15 = math.tanh %14 : vector<8x128xf32>
    %c0_12 = arith.constant 0 : index
    %c0_13 = arith.constant 0 : index
    %16 = vector.load %arg8[%c0_12, %c0_13] : memref<8x128xf32, #tpu.memory_space<vmem>>, vector<8x128xf32>
    tpu.vector_store %arg8[%c0_12, %c0_13], %15 {strides = array<i32>} : memref<8x128xf32, #tpu.memory_space<vmem>>, vector<8x128xf32>,
    %17 = vector.extract_strided_slice %13 {offsets = [0, 128], sizes = [8, 128], strides = [1, 1]} : vector<8x256xf32> to vector<8x128xf32>
    %cst_14 = arith.constant dense<0xFF800000> : vector<8xf32>
    %18 = vector.multi_reduction <maximumf>, %17, %cst_14 [1] : vector<8x128xf32> to vector<8xf32>
    %19 = vector.shape_cast %18 : vector<8xf32> to vector<8x1xf32>
    %20 = vector.broadcast %19 : vector<8x1xf32> to vector<8x128xf32>
    %21 = arith.subf %17, %20 : vector<8x128xf32>
    %22 = math.exp %21 : vector<8x128xf32>
    %cst_15 = arith.constant dense<0.000000e+00> : vector<8xf32>
    %23 = vector.multi_reduction <add>, %22, %cst_15 [1] : vector<8x128xf32> to vector<8xf32>
    %24 = vector.shape_cast %23 : vector<8xf32> to vector<8x1xf32>
    %25 = math.log %24 : vector<8x1xf32>
    %26 = vector.broadcast %25 : vector<8x1xf32> to vector<8x128xf32>
    %27 = arith.subf %21, %26 : vector<8x128xf32>
    %c0_16 = arith.constant 0 : index
    %c0_17 = arith.constant 0 : index
    %c0_18 = arith.constant 0 : index
    %28 = vector.load %arg6[%c0_16, %c0_17, %c0_18] : memref<1x8x128xf32, #tpu.memory_space<vmem>>, vector<1x8x128xf32>
    %29 = vector.shape_cast %28 : vector<1x8x128xf32> to vector<8x128xf32>
    %30 = vector.shape_cast %27 : vector<8x128xf32> to vector<1x8x128xf32>
    tpu.vector_store %arg6[%c0_16, %c0_17, %c0_18], %30 {strides = array<i32>} : memref<1x8x128xf32, #tpu.memory_space<vmem>>, vector<1x8x128xf32>,
    %c7_i32 = arith.constant 7 : i32
    %31 = arith.cmpi eq, %arg0, %c7_i32 : i32
    %32 = arith.extui %31 : i1 to i32
    %c0_i32_19 = arith.constant 0 : i32
    %33 = arith.cmpi ne, %32, %c0_i32_19 : i32
    scf.if %33 {
      %c0_20 = arith.constant 0 : index
      %c0_21 = arith.constant 0 : index
      %34 = vector.load %arg7[%c0_20, %c0_21] : memref<8x128xf32, #tpu.memory_space<vmem>>, vector<8x128xf32>
      tpu.vector_store %arg7[%c0_20, %c0_21], %15 {strides = array<i32>} : memref<8x128xf32, #tpu.memory_space<vmem>>, vector<8x128xf32>,
    } else {
    }
    return
  }
  func.func @transform_0(%arg0: i32) -> (i32, i32, i32) {
    %c0_i32 = arith.constant 0 : i32
    %c0_i32_0 = arith.constant 0 : i32
    %c0_i32_1 = arith.constant 0 : i32
    return %arg0, %c0_i32, %c0_i32_0 : i32, i32, i32
  }
  func.func @transform_1(%arg0: i32) -> (i32, i32) {
    %c0_i32 = arith.constant 0 : i32
    %c0_i32_0 = arith.constant 0 : i32
    %c0_i32_1 = arith.constant 0 : i32
    return %c0_i32, %c0_i32_0 : i32, i32
  }
  func.func @transform_2(%arg0: i32) -> (i32, i32) {
    %c0_i32 = arith.constant 0 : i32
    %c0_i32_0 = arith.constant 0 : i32
    %c0_i32_1 = arith.constant 0 : i32
    return %c0_i32, %c0_i32_0 : i32, i32
  }
  func.func @transform_3(%arg0: i32) -> (i32, i32) {
    %c0_i32 = arith.constant 0 : i32
    %c0_i32_0 = arith.constant 0 : i32
    %c0_i32_1 = arith.constant 0 : i32
    return %c0_i32, %c0_i32_0 : i32, i32
  }
  func.func @transform_4(%arg0: i32) -> (i32, i32) {
    %c0_i32 = arith.constant 0 : i32
    %c0_i32_0 = arith.constant 0 : i32
    %c0_i32_1 = arith.constant 0 : i32
    return %c0_i32, %c0_i32_0 : i32, i32
  }
  func.func @transform_5(%arg0: i32) -> (i32, i32, i32) {
    %c0_i32 = arith.constant 0 : i32
    %c0_i32_0 = arith.constant 0 : i32
    %c0_i32_1 = arith.constant 0 : i32
    return %arg0, %c0_i32, %c0_i32_0 : i32, i32, i32
  }
  func.func @transform_6(%arg0: i32) -> (i32, i32) {
    %c0_i32 = arith.constant 0 : i32
    %c0_i32_0 = arith.constant 0 : i32
    %c0_i32_1 = arith.constant 0 : i32
    return %c0_i32, %c0_i32_0 : i32, i32
  }
}

</mosaic_0001>

<bundles_post_ra>
// kernel: tpu_custom_call.1
= control target key start
LH: loop header
LB: loop body
LE: loop exit
PB: predicated region body
PF: predicated region fallthrough
CT: control target
= control target key end

     0   :  { %12 = vsyncpa [#allocation4], 0  ;;  %s1358_s0 = inlined_call_operand.hbm [shape: f32[8,8,16], index: 0, kind: input, shape index: {}]   ;;  %s1359_s1 = inlined_call_operand.hbm [shape: f32[8,128], index: 1, kind: input, shape index: {}]   ;;  %s1360_s2 = inlined_call_operand.hbm [shape: f32[16,256], index: 2, kind: input, shape index: {}]   ;;  %s1361_s3 = inlined_call_operand.hbm [shape: f32[128,256], index: 3, kind: input, shape index: {}]   ;;  %s1362_s4 = inlined_call_operand.vmem [shape: f32[1,256], index: 4, kind: input, shape index: {}]   ;;  %s1363_s5 = inlined_call_operand.hbm [shape: f32[8,8,128], index: 5, kind: output, shape index: {0}]   ;;  %s1364_s6 = inlined_call_operand.hbm [shape: f32[8,128], index: 6, kind: output, shape index: {1}]  }
   0x1   :  { %14 = vsyncpa [#allocation4 + $0x1], 0 }
   0x2   :  { %15 = vsyncpa [#allocation7], 0 }
   0x3   :  { %16 = vsyncpa [#allocation10], 0 }
   0x4   :  { %17 = vsyncpa [#allocation5], 0 }
   0x5   :  { %19 = vsyncpa [#allocation5 + $0x1], 0 }
   0x6   :  { %20 = vsyncpa [#allocation13], 0  ;;  %s1083_s21 = smov 0   ;;  %s1085_s22 = smov 0  }
   0x7   :  { %s1087_s23 = smov 0   ;;  %s1089_s24 = smov 0  }
   0x8 LB: > { %s1104_s25 = sadd.s32 4294967295, %s1037_s24   ;;  %s665_s26 = sadd.s32 4294967294, %s1037_s24   ;;  %s1037_s24 = sphi %s1089_s24, %s1392_s24   ;;  %s1033_s23 = sphi %s1087_s23, %s1391_s23   ;;  %s1029_s22 = sphi %s1085_s22, %s1390_s22   ;;  %s1025_s21 = sphi %s1083_s21, %s1389_s21  }
   0x9   : > { %p46_p0 = scmp.ne.s32.totalorder %s1029_s22, %s1025_s21  ;;  %p1365_p1 = scmp.eq.s32.totalorder %s1104_s25, 0 }
   0xa   : > { %p160_p3 = scmp.eq.s32.totalorder %s665_s26, 7  ;;  %p666_p5 = scmp.ge.s32.totalorder %s1037_s24, 1 }
   0xb   : > { %p1113_p4 = por %p1365_p1, %p46_p0  ;;  %p188_p7 = scmp.lt.s32.totalorder %s1037_s24, 9 }
   0xc   : > { %p1118_p6 = por %p160_p3, %p46_p0  ;;  %s1039_s30 = smov [#allocation6]  }
   0xd   : > { %s1368_s27 = scalar_select %p1113_p4, 1, 0 }
   0xe   : > { %s1369_s28 = scalar_select %p1118_p6, 1, 0 }
   0xf   : > { %p1124_p9 = pnand %p666_p5, %p188_p7  ;;  %s201_s7 = sshll.u32 %s1039_s30, 4  ;;  %s202_s7 = int_to_ptr.vmem [resolvable:$true] %s201_s7 }
  0x10   : > { %s1040_s8 = smov [#allocation8]   ;;  %s1041_s11 = smov [#allocation9]  }
  0x11   : > { %s1370_s29 = scalar_select %p1124_p9, 1, 0 }
  0x12   : > { %p746_p10 = pneg %p1124_p9  ;;  %s211_s9 = sshll.u32 %s1040_s8, 4  ;;  %s1136_s9 = int_to_ptr.vmem [resolvable:$true] %s211_s9 }
  0x13   : > { %s1138_s12 = sshll.u32 %s1041_s11, 4  ;;  %s819_s15 = scalar_lea.hbm %s1359_s1, 128  ;;  %s225_s12 = int_to_ptr.vmem [resolvable:$true] %s1138_s12 }
  0x14   : > { %p1132_p11 = pnand %p746_p10, %p1365_p1  ;;  %p820_p12 = scmp.ne.s32.totalorder %s1359_s1, %s819_s15 }
  0x15   : > { %p826_p5 = scmp.lt.u32.totalorder %s819_s15, %s1359_s1 }
  0x16   : > { %p1148_p13 = pneg %p1132_p11 }
  0x18   : > { %p822_p0 = pnand %p1148_p13, %p820_p12 }
  0x1a   : > { %p823_p3 = pneg %p822_p0 }
  0x1c   : > { %p828_p7 = pnand %p826_p5, %p823_p3 }
  0x1e   : > { %831 = shalt.err (!%p828_p7)
}
  0x1f   : > { %s832_s26 = scalar_lea.vmem %s202_s7, 128  ;;  %p840_p2 = scmp.lt.s32.totalorder %s202_s7, %s202_s7 }
  0x20   : > { %p833_p10 = scmp.ne.s32.totalorder %s202_s7, %s832_s26  ;;  %p841_p6 = scmp.lt.s32.totalorder %s832_s26, %s832_s26 }
  0x22   : > { %p835_p8 = pnand %p833_p10, %p1148_p13  ;;  %p842_p4 = por %p841_p6, %p840_p2 }
  0x24   : > { %p836_p1 = pneg %p835_p8 }
  0x26   : > { %p843_p9 = pnand %p842_p4, %p836_p1 }
  0x28   : > { %846 = shalt.err (!%p843_p9)
}
  0x29   : > { %749 = dma.hbm_to_vmem [thread:$0]  (!%p1132_p11), %s1359_s1, 128, %s202_s7, [#allocation7]  }
  0x2a   : > { %s847_s14 = scalar_lea.hbm %s1360_s2, 512 }
  0x2b   : > { %p848_p8 = scmp.ne.s32.totalorder %s1360_s2, %s847_s14  ;;  %p854_p1 = scmp.lt.u32.totalorder %s847_s14, %s1360_s2 }
  0x2d   : > { %p850_p12 = pnand %p848_p8, %p1148_p13 }
  0x2f   : > { %p851_p2 = pneg %p850_p12 }
  0x31   : > { %p856_p4 = pnand %p854_p1, %p851_p2 }
  0x33   : > { %859 = shalt.err (!%p856_p4)
}
  0x34   : > { %s860_s7 = scalar_lea.vmem %s1136_s9, 512  ;;  %p868_p3 = scmp.lt.s32.totalorder %s1136_s9, %s1136_s9 }
  0x35   : > { %p861_p6 = scmp.ne.s32.totalorder %s1136_s9, %s860_s7  ;;  %p869_p5 = scmp.lt.s32.totalorder %s860_s7, %s860_s7 }
  0x37   : > { %p863_p9 = pnand %p861_p6, %p1148_p13  ;;  %p870_p7 = por %p869_p5, %p868_p3 }
  0x39   : > { %p864_p0 = pneg %p863_p9 }
  0x3b   : > { %p871_p10 = pnand %p870_p7, %p864_p0 }
  0x3d   : > { %874 = shalt.err (!%p871_p10)
}
  0x3e   : > { %s1042_s20 = smov 256   ;;  %s1043_s26 = smov 16  }
  0x3f   : > { %752 = dma.hbm_to_vmem [thread:$0]  (!%p1132_p11), %s1360_s2, 512, %s1136_s9, [#allocation7], %s1042_s20, %s1042_s20, %s1043_s26  }
  0x40   : > { %s875_s14 = scalar_lea.hbm %s1361_s3, 4096 }
  0x41   : > { %p876_p8 = scmp.ne.s32.totalorder %s1361_s3, %s875_s14  ;;  %p882_p1 = scmp.lt.u32.totalorder %s875_s14, %s1361_s3 }
  0x43   : > { %p878_p12 = pnand %p876_p8, %p1148_p13 }
  0x45   : > { %p879_p2 = pneg %p878_p12 }
  0x47   : > { %p884_p4 = pnand %p882_p1, %p879_p2 }
  0x49   : > { %887 = shalt.err (!%p884_p4)
}
  0x4a   : > { %s888_s7 = scalar_lea.vmem %s225_s12, 4096  ;;  %p896_p3 = scmp.lt.s32.totalorder %s225_s12, %s225_s12 }
  0x4b   : > { %p889_p6 = scmp.ne.s32.totalorder %s225_s12, %s888_s7  ;;  %p897_p5 = scmp.lt.s32.totalorder %s888_s7, %s888_s7 }
  0x4d   : > { %p891_p9 = pnand %p889_p6, %p1148_p13  ;;  %p898_p7 = por %p897_p5, %p896_p3 }
  0x4f   : > { %p892_p0 = pneg %p891_p9 }
  0x51   : > { %p899_p10 = pnand %p898_p7, %p892_p0 }
  0x53   : > { %902 = shalt.err (!%p899_p10)
}
  0x54   : > { %755 = dma.hbm_to_vmem [thread:$0]  (!%p1132_p11), %s1361_s3, 4096, %s225_s12, [#allocation10], %s1042_s20, %s1042_s20, %s1043_s26  }
  0x55   : > { %s1207_s18 = sadd.s32 1, %s1037_s24   ;;  %s33_s10 = sadd.s32 1, %s1033_s23 }
  0x56   : > { %s30_s8 = ssub.s32 %s1037_s24, %s1207_s18  ;;  %p40_p8 = scmp.ne.s32.totalorder %s1033_s23, %s1029_s22 }
  0x57   : > { %p31_p13 = scmp.eq.s32.totalorder %s30_s8, 0  ;;  %p41_p12 = scmp.eq.s32.totalorder %s1037_s24, 0 }
  0x58   : > { %p767_p2 = scmp.lt.s32.totalorder %s1037_s24, 8  ;;  %p1373_p4 = scmp.eq.s32.totalorder %s1104_s25, 7 }
  0x59   : > { %s1217_s11 = scalar_select %p31_p13, %s1033_s23, %s33_s10  }
  0x5a   : > { %p42_p1 = por %p41_p12, %p40_p8  ;;  %p1221_p6 = por %p1373_p4, %p40_p8 }
  0x5b   : > { %s241_s14 = sand.u32 1, %s1033_s23   ;;  %s672_s15 = sshll.u32 %s1037_s24, 7 }
  0x5c   : > { %s671_s12 = sshll.u32 %s241_s14, 3  ;;  %s1230_s16 = scalar_lea.hbm %s1358_s0, %s672_s15 }
  0x5d   : > { %s245_s17 = scalar_lea.vmem [#allocation3], %s671_s12  ;;  %p1232_p11 = pnand %p767_p2, %p42_p1 }
  0x5e   : > { %s252_s19 = sshll.u32 %s245_s17, 4  ;;  %s242_s9 = scalar_lea.sflag [#allocation4], %s241_s14  ;;  %s1236_s19 = int_to_ptr.vmem [resolvable:$true] %s252_s19 }
  0x5f   : > { %s903_s30 = scalar_lea.hbm %s1230_s16, 128  ;;  %p905_p0 = pneg %p1232_p11 }
  0x60   : > { %p904_p9 = scmp.ne.s32.totalorder %s1230_s16, %s903_s30  ;;  %s908_s15 = scalar_lea.hbm %s1358_s0, 1024 }
  0x61   : > { %p909_p7 = scmp.lt.u32.totalorder %s1230_s16, %s1358_s0  ;;  %p910_p10 = scmp.lt.u32.totalorder %s908_s15, %s903_s30 }
  0x62   : > { %p906_p3 = pnand %p905_p0, %p904_p9  ;;  %p912_p8 = scmp.lt.u32.totalorder %s903_s30, %s1230_s16 }
  0x63   : > { %p911_p13 = por %p910_p10, %p909_p7 }
  0x64   : > { %p907_p5 = pneg %p906_p3 }
  0x65   : > { %p913_p12 = por %p912_p8, %p911_p13 }
  0x67   : > { %p914_p2 = pnand %p913_p12, %p907_p5 }
  0x69   : > { %917 = shalt.err (!%p914_p2)
}
  0x6a   : > { %s918_s14 = scalar_lea.vmem %s1236_s19, 128  ;;  %s1044_s26 = smov [#allocation3]  }
  0x6b   : > { %p919_p1 = scmp.ne.s32.totalorder %s1236_s19, %s918_s14  ;;  %s923_s17 = sshll.u32 %s1044_s26, 4  ;;  %s924_s17 = int_to_ptr.vmem [resolvable:$false] %s923_s17 }
  0x6c   : > { %s925_s8 = scalar_lea.vmem %s924_s17, 256  ;;  %p926_p3 = scmp.lt.s32.totalorder %s1236_s19, %s924_s17 }
  0x6d   : > { %p921_p4 = pnand %p919_p1, %p905_p0  ;;  %p927_p7 = scmp.lt.s32.totalorder %s925_s8, %s918_s14 }
  0x6f   : > { %p922_p9 = pneg %p921_p4  ;;  %p928_p10 = por %p927_p7, %p926_p3 }
  0x71   : > { %p929_p13 = pnand %p928_p10, %p922_p9 }
  0x73   : > { %932 = shalt.err (!%p929_p13)
}
  0x74   : > { %759 = dma.hbm_to_vmem [thread:$0]  (!%p1232_p11), %s1230_s16, 128, %s1236_s19, %s242_s9  }
  0x75   : > { %p1376_p5 = scmp.ne.s32.totalorder %s1370_s29, 0 }
  0x76   : > { %s1266_s30 = sand.u32 (!%p1376_p5), 1, %s1029_s22   ;;  %p1377_p0 = scmp.ne.s32.totalorder (!%p1376_p5), %s1368_s27, 0 }
  0x77   : > { %261 = sbr.rel (%p1376_p5) target bundleno = 763 (0x2fb), region = 40  ;;  %s674_s10 = sshll.u32 (!%p1376_p5), %s1266_s30, 3 }
  0x78   : > { %s264_s15 = scalar_lea.sflag (!%p1376_p5), [#allocation4], %s1266_s30  ;;  %s1270_s12 = scalar_lea.vmem (!%p1376_p5), [#allocation3], %s674_s10 }
  0x7e   : > { %1004 = dma.done.wait (%p1377_p0), %s264_s15, 128  }
  0x7f   : > { %1006 = vsyncadd (%p1377_p0), %s264_s15, 4294967168  ;;  %p1378_p11 = scmp.eq.s32.totalorder %s1104_s25, 0 }
  0x81   : > { %1008 = dma.done.wait (%p1378_p11), [#allocation7], 640   ;;  %p1379_p8 = pmov %p1378_p11 }
  0x83   : > { %1010 = vsyncadd (%p1379_p8), [#allocation7], 4294966656  ;;  %p1380_p12 = pmov %p1379_p8 }
  0x84   : > { %p1381_p2 = pmov %p1379_p8 }
  0x85   : > { %1012 = dma.done.wait (%p1380_p12), [#allocation10], 4096  }
  0x86   : > { %1014 = vsyncadd (%p1381_p2), [#allocation10], 4294963200  ;;  %s1284_s29 = scalar_lea.vmem [#allocation11], %s674_s10  ;;  %p1382_p1 = scmp.ne.s32.totalorder %s1104_s25, 0 }
  0x87   : > { %v312_v0 = vld [vmem:[#allocation6] sm:$0xff] (!%p1382_p1) }
  0x88   : > { %311 = sbr.rel (%p1382_p1) target bundleno = 143 (0x8f), region = 60  ;;  %313 = vst [vmem:[#allocation2] sm:$0xff] (!%p1382_p1), %v312_v0 }
  0x8f PF: > { %v321_v1 = vld [vmem:[#allocation9 + $0x8] sm:$0xff]  ;;  %v323_v2 = vld [vmem:[#allocation9 + $0x18] sm:$0xff]  ;;  %v320_v3 = vld [vmem:[#allocation9] sm:$0xff]  ;;  %v1045_v8 = vmov 0.0   ;;  %vm423_vm0 = vcmask 130048   ;;  %v500_v60 = vlaneseq  ;;  %p681_p4 = scmp.ne.s32.totalorder %s1104_s25, 7 }
  0x90   : > { %v688_v4 = vpack.c.bf16 %v323_v2, %v321_v1  ;;  %v322_v5 = vld [vmem:[#allocation9 + $0x10] sm:$0xff]  ;;  %v325_v6 = vld [vmem:[#allocation9 + $0x28] sm:$0xff]  ;;  %v327_v7 = vld [vmem:[#allocation9 + $0x38] sm:$0xff]  ;;  %491 = vmatprep.mubr.f32.mxu0 %v1045_v8  ;;  %416 = vmatprep.mubr.f32.mxu1 %v1045_v8 }
  0x91   : > { %v690_v9 = vpack.c.bf16 %v322_v5, %v320_v3  ;;  %v692_v10 = vpack.c.bf16 %v327_v7, %v325_v6  ;;  %v324_v11 = vld [vmem:[#allocation9 + $0x20] sm:$0xff]  ;;  %v326_v12 = vld [vmem:[#allocation9 + $0x30] sm:$0xff]  ;;  %v329_v13 = vld [vmem:[#allocation9 + $0x48] sm:$0xff]  ;;  %v501_v61 = vshrl.u32 %v500_v60, 7 }
  0x92   : > { %689 = vmatprep.subr.bf16.mxu1 %v688_v4  ;;  %v331_v14 = vld [vmem:[#allocation9 + $0x58] sm:$0xff]  ;;  %v694_v15 = vpack.c.bf16 %v326_v12, %v324_v11  ;;  %v328_v17 = vld [vmem:[#allocation9 + $0x40] sm:$0xff]  ;;  %v330_v18 = vld [vmem:[#allocation9 + $0x50] sm:$0xff] }
  0x93   : > { %691 = vmatpush1.bf16.msra.mxu1 %v690_v9  ;;  %v696_v16 = vpack.c.bf16 %v331_v14, %v329_v13  ;;  %v333_v19 = vld [vmem:[#allocation9 + $0x68] sm:$0xff]  ;;  %v335_v20 = vld [vmem:[#allocation9 + $0x78] sm:$0xff]  ;;  %v698_v21 = vpack.c.bf16 %v330_v18, %v328_v17  ;;  %v332_v22 = vld [vmem:[#allocation9 + $0x60] sm:$0xff]  ;;  %v502_v62 = vsub.s32 0, %v501_v61  ;;  %v506_v0 = vsub.s32 1, %v501_v61 }
  0x94   : > { %693 = vmatprep.subr.bf16.mxu1 %v692_v10  ;;  %v700_v23 = vpack.c.bf16 %v335_v20, %v333_v19  ;;  %v334_v24 = vld [vmem:[#allocation9 + $0x70] sm:$0xff]  ;;  %v317_v25 = vld [vmem:[#allocation8 + $0x8] sm:$0xff]  ;;  %v319_v26 = vld [vmem:[#allocation8 + $0x18] sm:$0xff] }
  0x95   : > { %v337_v27 = vld [vmem:[#allocation9 + $0x88] sm:$0xff]  ;;  %v339_v28 = vld [vmem:[#allocation9 + $0x98] sm:$0xff]  ;;  %v720_v29 = vpack.c.bf16 %v319_v26, %v317_v25  ;;  %v316_v30 = vld [vmem:[#allocation8] sm:$0xff]  ;;  %v702_v32 = vpack.c.bf16 %v334_v24, %v332_v22 }
  0x96   : > { %v318_v31 = vld [vmem:[#allocation8 + $0x10] sm:$0xff]  ;;  %v704_v34 = vpack.c.bf16 %v339_v28, %v337_v27  ;;  %v336_v35 = vld [vmem:[#allocation9 + $0x80] sm:$0xff]  ;;  %v341_v37 = vld [vmem:[#allocation9 + $0xa8] sm:$0xff] }
  0x97   : > { %695 = vmatpush1.bf16.msra.mxu1 %v694_v15  ;;  %721 = vmatprep.subr.bf16.mxu0 %v720_v29  ;;  %v722_v33 = vpack.c.bf16 %v318_v31, %v316_v30  ;;  %v338_v36 = vld [vmem:[#allocation9 + $0x90] sm:$0xff]  ;;  %v343_v38 = vld [vmem:[#allocation9 + $0xb8] sm:$0xff]  ;;  %v340_v42 = vld [vmem:[#allocation9 + $0xa0] sm:$0xff] }
  0x98   : > { %697 = vmatprep.subr.bf16.mxu1 %v696_v16  ;;  %v314_v39 = vld [vmem:[%s1270_s12] sm:$0xff]  ;;  %v706_v40 = vpack.c.bf16 %v338_v36, %v336_v35  ;;  %v708_v41 = vpack.c.bf16 %v343_v38, %v341_v37  ;;  %v347_v45 = vld [vmem:[#allocation9 + $0xd8] sm:$0xff]  ;;  %v344_v48 = vld [vmem:[#allocation9 + $0xc0] sm:$0xff] }
  0x99   : > { %723 = vmatpush1.bf16.msra.mxu0 %v722_v33  ;;  %v342_v43 = vld [vmem:[#allocation9 + $0xb0] sm:$0xff]  ;;  %v345_v44 = vld [vmem:[#allocation9 + $0xc8] sm:$0xff]  ;;  %v351_v51 = vld [vmem:[#allocation9 + $0xf8] sm:$0xff] }
  0x9a   : > { %v710_v46 = vpack.c.bf16 %v342_v43, %v340_v42  ;;  %v712_v47 = vpack.c.bf16 %v347_v45, %v345_v44  ;;  %v346_v49 = vld [vmem:[#allocation9 + $0xd0] sm:$0xff]  ;;  %v349_v50 = vld [vmem:[#allocation9 + $0xe8] sm:$0xff]  ;;  %v348_v54 = vld [vmem:[#allocation9 + $0xe0] sm:$0xff] }
  0x9b   : > { %699 = vmatpush1.bf16.msra.mxu1 %v698_v21  ;;  %v714_v52 = vpack.c.bf16 %v346_v49, %v344_v48  ;;  %v716_v53 = vpack.c.bf16 %v351_v51, %v349_v50  ;;  %v350_v55 = vld [vmem:[#allocation9 + $0xf0] sm:$0xff]  ;;  %v315_v57 = vld [vmem:[#allocation2] sm:$0xff] }
  0x9c   : > { %701 = vmatprep.subr.bf16.mxu1 %v700_v23  ;;  %680 = vmatmul.mubr.msk.f32.vlgmr.msra.gmra.mrb[0].mxu0 %vm423_vm0, %v314_v39  ;;  %v718_v56 = vpack.c.bf16 %v350_v55, %v348_v54  ;;  %v498_v63 = vld [vmem:[%s1362_s4] sm:$0x3] }
  0x9d   : > { %v503_v1 = vrot.slane %v498_v63, %v502_v62  ;;  %v507_v3 = vrot.slane %v498_v63, %v506_v0 }
  0x9f   : > { %703 = vmatpush1.bf16.msra.mxu1 %v702_v32 }
  0xa0   : > { %705 = vmatprep.subr.bf16.mxu1 %v704_v34 }
  0xa3   : > { %707 = vmatpush1.bf16.msra.mxu1 %v706_v40 }
  0xa4   : > { %709 = vmatprep.subr.bf16.mxu1 %v708_v41 }
  0xa7   : > { %711 = vmatpush1.bf16.msra.mxu1 %v710_v46 }
  0xa8   : > { %713 = vmatprep.subr.bf16.mxu1 %v712_v47 }
  0xab   : > { %715 = vmatpush1.bf16.msra.mxu1 %v714_v52 }
  0xac   : > { %717 = vmatprep.subr.bf16.mxu1 %v716_v53 }
  0xaf   : > { %719 = vmatpush1.bf16.msra.mxu1 %v718_v56 }
  0xb2   : > { %417 = vmatmul.mubr.f32.vlgmr.msra.gmra.mrb[0].mxu1 %v315_v57 }
 0x16f   : > { %v493_v58 = vpop.f32.mrb[0].mxu0 }
 0x170   : > { %v495_v59 = vpop.f32.mrb[1].mxu0 }
 0x185   : > { %v418_v2 = vpop.f32.mrb[0].mxu1 }
 0x186   : > { %v494_v4 = vadd.f32 %v493_v58, %v418_v2  ;;  %v420_v5 = vpop.f32.mrb[1].mxu1 }
 0x187   : > { %v496_v6 = vadd.f32 %v495_v59, %v420_v5 }
 0x188   : > { %v510_v7 = vadd.f32 %v503_v1, %v494_v4 }
 0x189   : > { %v511_v8 = vadd.f32 %v507_v3, %v496_v6 }
 0x18a   : > { %813 = vtanh.f32 %v510_v7 }
 0x18b   : > { %514 = vmax.xlane.f32.xlu0 %v511_v8 }
 0x194   : > { %v814_v9 = vpop.eup %813 }
 0x195   : > { %513 = vst [vmem:[#allocation2] sm:$0xff] %v814_v9  ;;  %529 = vst [vmem:[#allocation12] sm:$0xff] (!%p681_p4), %v814_v9 }
 0x218   : > { %v515_v10 = vpop.xlane.xlu0 %514 }
 0x219   : > { %v516_v11 = vsub.f32 %v511_v8, %v515_v10 }
 0x21b   : > { %v517_v12 = vmul.f32 1.442695, %v516_v11 }
 0x21d   : > { %815 = vpow2.f32 %v517_v12 }
 0x227   : > { %v816_v13 = vpop.eup %815 }
 0x228   : > { %519 = vadd.xlane.f32.xlu0 %v816_v13 }
 0x2b5   : > { %v520_v14 = vpop.xlane.xlu0 %519 }
 0x2b6   : > { %817 = vlog2.f32 %v520_v14 }
 0x2bf   : > { %528 = sbr.rel (%p681_p4) target bundleno = 710 (0x2c6), region = 64 }
 0x2c0   : > { %v818_v15 = vpop.eup %817 }
 0x2c1   : > { %v522_v16 = vmul.f32 0.6931472, %v818_v15 }
 0x2c3   : > { %v523_v17 = vsub.f32 %v516_v11, %v522_v16 }
 0x2c5   : > { %524 = vst [vmem:[%s1284_s29] sm:$0xff] %v523_v17 }
 0x2c6 PF: > { %s683_s19 = sshll.u32 %s1104_s25, 7  ;;  %s544_s14 = sshll.u32 %s1284_s29, 4  ;;  %s545_s14 = int_to_ptr.vmem [resolvable:$true] %s544_s14 }
 0x2c7   : > { %s1298_s20 = scalar_lea.hbm %s1363_s5, %s683_s19  ;;  %s531_s26 = scalar_lea.sflag [#allocation5], %s1266_s30 }
 0x2c8   : > { %s933_s17 = scalar_lea.vmem %s545_s14, 128  ;;  %s1046_s8 = smov [#allocation11]  }
 0x2c9   : > { %p934_p9 = scmp.ne.s32.totalorder %s545_s14, %s933_s17  ;;  %s937_s10 = sshll.u32 %s1046_s8, 4  ;;  %s938_s10 = int_to_ptr.vmem [resolvable:$false] %s937_s10 }
 0x2ca   : > { %s939_s15 = scalar_lea.vmem %s938_s10, 256  ;;  %p940_p10 = scmp.lt.s32.totalorder %s545_s14, %s938_s10 }
 0x2cb   : > { %p935_p3 = pnand %p934_p9, %p1221_p6  ;;  %p941_p13 = scmp.lt.s32.totalorder %s939_s15, %s933_s17 }
 0x2cd   : > { %p936_p7 = pneg %p935_p3  ;;  %p942_p5 = por %p941_p13, %p940_p10 }
 0x2cf   : > { %p943_p0 = pnand %p942_p5, %p936_p7 }
 0x2d1   : > { %946 = shalt.err (!%p943_p0)
}
 0x2d2   : > { %s947_s30 = scalar_lea.hbm %s1298_s20, 128  ;;  %s951_s27 = scalar_lea.hbm %s1363_s5, 1024 }
 0x2d3   : > { %p948_p11 = scmp.ne.s32.totalorder %s1298_s20, %s947_s30  ;;  %p952_p2 = scmp.lt.u32.totalorder %s1298_s20, %s1363_s5 }
 0x2d4   : > { %p953_p1 = scmp.lt.u32.totalorder %s951_s27, %s947_s30  ;;  %p955_p9 = scmp.lt.u32.totalorder %s947_s30, %s1298_s20 }
 0x2d5   : > { %p949_p8 = pnand %p948_p11, %p1221_p6 }
 0x2d6   : > { %p954_p4 = por %p953_p1, %p952_p2 }
 0x2d7   : > { %p950_p12 = pneg %p949_p8 }
 0x2d8   : > { %p956_p3 = por %p955_p9, %p954_p4 }
 0x2da   : > { %p957_p7 = pnand %p956_p3, %p950_p12 }
 0x2dc   : > { %960 = shalt.err (!%p957_p7)
}
 0x2dd   : > { %740 = dma.vmem_to_hbm [thread:$0]  (%p1221_p6), %s545_s14, 128, %s1298_s20, %s531_s26  }
 0x2de   : > { %s1047_s7 = smov [#allocation12]   ;;  %p1383_p13 = scmp.eq.s32.totalorder %s1104_s25, 7 }
 0x2df   : > { %s555_s9 = sshll.u32 %s1047_s7, 4  ;;  %s556_s9 = int_to_ptr.vmem [resolvable:$true] %s555_s9 }
 0x2e0   : > { %s961_s17 = scalar_lea.vmem %s556_s9, 128  ;;  %p968_p11 = scmp.lt.s32.totalorder %s556_s9, %s556_s9 }
 0x2e1   : > { %p962_p10 = scmp.ne.s32.totalorder %s556_s9, %s961_s17  ;;  %p969_p8 = scmp.lt.s32.totalorder %s961_s17, %s961_s17 }
 0x2e3   : > { %p963_p5 = pnand %p962_p10, %p1383_p13  ;;  %p970_p2 = por %p969_p8, %p968_p11 }
 0x2e5   : > { %p964_p0 = pneg %p963_p5 }
 0x2e7   : > { %p971_p1 = pnand %p970_p2, %p964_p0 }
 0x2e9   : > { %974 = shalt.err (!%p971_p1)
}
 0x2ea   : > { %s975_s13 = scalar_lea.hbm %s1364_s6, 128  ;;  %p1384_p12 = pmov %p1383_p13 }
 0x2eb   : > { %p976_p6 = scmp.ne.s32.totalorder %s1364_s6, %s975_s13  ;;  %p981_p3 = scmp.lt.u32.totalorder %s975_s13, %s1364_s6 }
 0x2ed   : > { %p977_p4 = pnand %p976_p6, %p1384_p12 }
 0x2ef   : > { %p978_p9 = pneg %p977_p4 }
 0x2f1   : > { %p983_p7 = pnand %p981_p3, %p978_p9 }
 0x2f3   : > { %986 = shalt.err (!%p983_p7)
}
 0x2f4   : > { %p1385_p10 = pmov %p1384_p12 }
 0x2f6   : > { %742 = dma.vmem_to_hbm [thread:$0]  (%p1385_p10), %s556_s9, 128, %s1364_s6, [#allocation13]  }
 0x2f7   : > { %p1386_p13 = pmov %p1385_p10 }
 0x2f8   : > { %p1387_p5 = pmov %p1385_p10 }
 0x2f9   : > { %1016 = dma.done.wait (%p1386_p13), [#allocation13], 128  }
 0x2fa   : > { %1018 = vsyncadd (%p1387_p5), [#allocation13], 4294967168 }
 0x2fb PF: > { %p773_p0 = scmp.ge.s32.totalorder %s1037_s24, 2  ;;  %s571_s29 = sand.u32 1, %s1025_s21  }
 0x2fc   : > { %p1388_p11 = scmp.ne.s32.totalorder %s1369_s28, 0  ;;  %s572_s27 = scalar_lea.sflag [#allocation5], %s571_s29 }
 0x2fe   : > { %p761_p8 = pnand %p773_p0, %p1388_p11 }
 0x300   : > { %1020 = dma.done.wait (!%p761_p8), %s572_s27, 128  }
 0x301   : > { %1022 = vsyncadd (!%p761_p8), %s572_s27, 4294967168  ;;  %p23_p2 = scmp.ge.s32.totalorder %s1207_s18, 10   ;;  %s1389_s21 = smov %s1029_s22 }
 0x302   : > { %s1390_s22 = smov %s1033_s23  ;;  %s1391_s23 = smov %s1217_s11 }
 0x303   : > { %s1392_s24 = smov %s1207_s18  ;;  %25 = sbr.rel (!%p23_p2) target bundleno = 8 (0x8), region = 113 }
 0x30a   :  { %577 = vsyncpa [#allocation4], 1 }
 0x30b   :  { %579 = vsyncpa [#allocation4 + $0x1], 1 }
 0x30c   :  { %580 = vsyncpa [#allocation7], 1 }
 0x30d   :  { %581 = vsyncpa [#allocation10], 1 }
 0x30e   :  { %582 = vsyncpa [#allocation5], 1 }
 0x30f   :  { %584 = vsyncpa [#allocation5 + $0x1], 1 }
 0x310   :  { %585 = vsyncpa [#allocation13], 1 }

</bundles_post_ra>
